<compile_context>
chip_gen: v7x
topology: tpu7x:2x2x1
jax: 0.10.0
libtpu: 0.0.40
codegen_flags: <defaults>
</compile_context>

<pallas_src>
import functools

import jax
import jax.numpy as jnp
from jax import lax
from jax.experimental import pallas as pl
from jax.experimental.pallas import tpu as pltpu


def _round_up(a, b):
    return ((a + b - 1) // b) * b


def _largest_divisor_leq(n, m):
    m = max(1, min(n, m))
    for d in range(m, 0, -1):
        if n % d == 0:
            return d
    return 1


def _peg_kernel(x_ref, w_ref, b_ref, out_ref, slab_ref, *,
                H, W, C, k, bt, halo_top, n_chunk, copy_tokens):
    # x_ref    : (bt, N, C)   raw tokens for bt images, N = 1 + H*W
    # w_ref    : (k*k, C)     depthwise weights, row dy*k+dx (centre tap already has +1)
    # b_ref    : (1, C)       bias
    # out_ref  : (bt, N, C)   cls passthrough + (conv + bias + residual) tokens
    # slab_ref : (S, C)       VMEM scratch, token layout with zero row-halo top/bottom
    f32 = jnp.float32
    p = k // 2
    HW = H * W
    S = slab_ref.shape[0]
    n_chunks = HW // n_chunk
    n_copies = HW // copy_tokens
    aligned = (W % 8 == 0)          # all slab offsets are multiples of 8 in this case
    slab_dtype = slab_ref.dtype

    # ---- hoisted parameter loads (once per grid step) ----
    wt = [w_ref[t:t + 1, :].astype(f32) for t in range(k * k)]   # per-tap (1, C) rows
    bias = b_ref[...].astype(f32)                                # (1, C)

    # cls token passthrough for every image in this block
    out_ref[:, 0:1, :] = x_ref[:, 0:1, :]

    # Hoisted column-boundary masks for the dx shifts. Chunks start on row boundaries,
    # so token i of a chunk sits in image column (i mod W).
    col = lax.broadcasted_iota(jnp.int32, (n_chunk, 1), 0) % W
    masks = {}
    for off in range(-p, p + 1):
        if off != 0:
            masks[off] = jnp.logical_and(col + off >= 0, col + off < W)

    # Zero the row-halo regions once per grid step (interior is rewritten per image).
    if halo_top > 0:
        slab_ref[0:halo_top, :] = jnp.zeros((halo_top, C), slab_dtype)
    if S > halo_top + HW:
        slab_ref[halo_top + HW:S, :] = jnp.zeros((S - halo_top - HW, C), slab_dtype)

    def image_body(b, carry):
        # ---- Phase 1: bulk copy of this image's feature tokens into the slab interior ----
        def copy_body(j, c):
            c0 = j * copy_tokens
            src = x_ref[b, pl.ds(1 + c0, copy_tokens), :]        # misaligned by 1 (input layout)
            dst0 = halo_top + c0
            if aligned:
                dst0 = pl.multiple_of(dst0, 8)
            slab_ref[pl.ds(dst0, copy_tokens), :] = src.astype(slab_dtype)
            return c

        lax.fori_loop(0, n_copies, copy_body, 0)

        # ---- Phase 2: k*k-tap depthwise conv (+bias; residual folded into centre weight) ----
        def chunk_body(ci, c):
            t0 = ci * n_chunk
            base = halo_top + t0
            parts = [None] * k                 # per-dx partial sums over dy
            for dy in range(k):
                start = base + (dy - p) * W
                if aligned:
                    start = pl.multiple_of(start, 8)
                cdy = slab_ref[pl.ds(start, n_chunk), :].astype(f32)
                for dx in range(k):
                    term = cdy * wt[dy * k + dx]
                    parts[dx] = term if parts[dx] is None else parts[dx] + term
            # centre column needs no shift; bias folded into the init
            acc = parts[p] + bias
            for dx in range(k):
                off = dx - p
                if off == 0:
                    continue
                rolled = pltpu.roll(parts[dx], (-off) % n_chunk, 0)   # XLU sublane rotate
                acc = acc + jnp.where(masks[off], rolled, 0.0)
            out_ref[b, pl.ds(1 + t0, n_chunk), :] = acc.astype(out_ref.dtype)
            return c

        lax.fori_loop(0, n_chunks, chunk_body, 0)
        return carry

    lax.fori_loop(0, bt, image_body, 0)


def _pick_batch_tile(B, per_image_bytes, slab_bytes, *,
                     target_bytes=8 << 20, vmem_budget=36 << 20):
    """Largest divisor of B with block <= ~8 MiB, >= 2 grid steps (B >= 2), even steps preferred."""
    def ok(bt, require_even):
        if B % bt:
            return False
        steps = B // bt
        if B >= 2 and steps < 2:
            return False
        if require_even and steps % 2:
            return False
        if bt * per_image_bytes > target_bytes:
            return False
        if 4 * bt * per_image_bytes + slab_bytes > vmem_budget:
            return False
        return True

    for require_even in (True, False):        # even step count keeps both v7x TCs busy
        for bt in range(B, 0, -1):
            if ok(bt, require_even):
                return bt
    return 1


def peg_forward(x, weight_kkc, bias_c, H, W, *, k=3, batch_tile=None, chunk_tokens=128):
    """PEG forward.

    x:          (B, N, C) with N = 1 + H*W
    weight_kkc: (k, k, C) depthwise conv weights (torch weight[:, 0] transposed to (k,k,C))
    bias_c:     (C,)
    returns:    (B, N, C)
    """
    B, N, C = x.shape
    assert N == 1 + H * W
    p = k // 2
    assert k % 2 == 1 and p < max(W, 1)
    assert weight_kkc.shape == (k, k, C)

    # Fold the residual into the centre tap: conv(feat, w) + feat == conv(feat, w'), w'[p,p]+=1.
    w_flat = weight_kkc.reshape(k * k, C)
    w_flat = w_flat.at[p * k + p].add(jnp.asarray(1.0, w_flat.dtype))
    bias2d = bias_c.reshape(1, C)

    HW = H * W
    halo_top = _round_up(p * W, 8)
    halo_bot = _round_up(p * W, 8)
    S = halo_top + HW + halo_bot

    slab_dtype = x.dtype if (x.dtype == jnp.bfloat16 or x.dtype == jnp.float32) else jnp.float32
    slab_bytes = S * C * jnp.dtype(slab_dtype).itemsize

    # rows per compute chunk / copy chunk (divisors of H so every chunk is full-size)
    rc = _largest_divisor_leq(H, max(chunk_tokens // max(W, 1), 1))
    n_chunk = rc * W
    rcopy = _largest_divisor_leq(H, max(256 // max(W, 1), 1))
    copy_tokens = rcopy * W

    per_image_bytes = N * C * x.dtype.itemsize
    bt = batch_tile if batch_tile is not None else _pick_batch_tile(
        B, per_image_bytes, slab_bytes)
    assert B % bt == 0
    grid = (B // bt,)

    io_bytes = 2 * 2 * bt * per_image_bytes          # double-buffered in + out blocks
    need = slab_bytes + io_bytes + 2 * (k * k + 1) * C * 4
    # 48 MiB ceiling: leaves headroom on v7x (64 MiB total VMEM) for Mosaic internal scratch.
    vmem_limit = int(min(max(int(need * 1.5), 8 << 20), 48 << 20))

    kernel = functools.partial(_peg_kernel, H=H, W=W, C=C, k=k, bt=bt,
                               halo_top=halo_top, n_chunk=n_chunk,
                               copy_tokens=copy_tokens)

    return pl.pallas_call(
        kernel,
        out_shape=jax.ShapeDtypeStruct((B, N, C), x.dtype),
        grid_spec=pltpu.PrefetchScalarGridSpec(
            num_scalar_prefetch=0,
            grid=grid,
            in_specs=[
                pl.BlockSpec((bt, N, C), lambda g: (g, 0, 0)),
                pl.BlockSpec((k * k, C), lambda g: (0, 0)),
                pl.BlockSpec((1, C), lambda g: (0, 0)),
            ],
            out_specs=pl.BlockSpec((bt, N, C), lambda g: (g, 0, 0)),
            scratch_shapes=[pltpu.VMEM((S, C), slab_dtype)],
        ),
        compiler_params=pltpu.CompilerParams(
            dimension_semantics=("parallel",),
            vmem_limit_bytes=vmem_limit,
        ),
    )(x, w_flat, bias2d)


def peg_reference(x, weight_kkc, bias_c, H, W, *, k=3):
    """Pure-JAX reference (depthwise conv via lax.conv_general_dilated)."""
    B, N, C = x.shape
    pad = k // 2
    cls_token = x[:, :1, :]
    feat = x[:, 1:, :].reshape(B, H, W, C)
    rhs = weight_kkc.reshape(k, k, 1, C)     # HWIO, feature_group_count=C
    conv = lax.conv_general_dilated(
        feat, rhs, window_strides=(1, 1), padding=((pad, pad), (pad, pad)),
        dimension_numbers=("NHWC", "HWIO", "NHWC"), feature_group_count=C)
    y = conv + bias_c[None, None, None, :] + feat
    return jnp.concatenate([cls_token, y.reshape(B, H * W, C)], axis=1)


if __name__ == "__main__":
    # Small but lane-dense shapes: C multiple of 128, even number of grid blocks.
    B, C, H, W, k = 8, 128, 16, 16, 3
    N = 1 + H * W

    key = jax.random.PRNGKey(0)
    kx, kw, kb = jax.random.split(key, 3)

    x = jax.random.normal(kx, (B, N, C), dtype=jnp.float32)
    # nn.Conv2d(dim, dim, k, groups=dim) -> weight (C, 1, k, k), bias (C,)
    weight_torch = jax.random.normal(kw, (C, 1, k, k), dtype=jnp.float32) * 0.1
    bias = jax.random.normal(kb, (C,), dtype=jnp.float32) * 0.1
    weight_kkc = jnp.transpose(weight_torch[:, 0, :, :], (1, 2, 0))   # (k, k, C)

    out = peg_forward(x, weight_kkc, bias, H, W, k=k)
    out = jax.block_until_ready(out)

    ref = peg_reference(x, weight_kkc, bias, H, W, k=k)
    assert out.shape == (B, N, C)
    assert jnp.allclose(out, ref, atol=1e-4, rtol=1e-4), "mismatch vs reference"

    print("KERNEL_OK")
</pallas_src>

<mosaic_0001>
module attributes {stable_mosaic.version = 11 : i64} {
  func.func @_peg_kernel(%arg0: i32, %arg1: memref<4x257x128xf32, #tpu.memory_space<vmem>>, %arg2: memref<9x128xf32, #tpu.memory_space<vmem>>, %arg3: memref<1x128xf32, #tpu.memory_space<vmem>>, %arg4: memref<4x257x128xf32, #tpu.memory_space<vmem>>, %arg5: memref<288x128xf32, #tpu.memory_space<vmem>>) attributes {dimension_semantics = [#tpu.dimension_semantics<parallel>], iteration_bounds = array<i64: 2>, scalar_prefetch = 0 : i64, scratch_operands = 1 : i64, tpu.core_type = #tpu.core_type<tc>, window_params = [{transform_indices = @transform_0, window_bounds = array<i64: 4, 257, 128>}, {pipeline_mode = #tpu.pipeline_mode<synchronous>, transform_indices = @transform_1, window_bounds = array<i64: 9, 128>}, {pipeline_mode = #tpu.pipeline_mode<synchronous>, transform_indices = @transform_2, window_bounds = array<i64: 1, 128>}, {transform_indices = @transform_3, window_bounds = array<i64: 4, 257, 128>}]} {
    %c0 = arith.constant 0 : index
    %c0_0 = arith.constant 0 : index
    %0 = vector.load %arg2[%c0, %c0_0] : memref<9x128xf32, #tpu.memory_space<vmem>>, vector<1x128xf32>
    %c1 = arith.constant 1 : index
    %c0_1 = arith.constant 0 : index
    %1 = vector.load %arg2[%c1, %c0_1] : memref<9x128xf32, #tpu.memory_space<vmem>>, vector<1x128xf32>
    %c2 = arith.constant 2 : index
    %c0_2 = arith.constant 0 : index
    %2 = vector.load %arg2[%c2, %c0_2] : memref<9x128xf32, #tpu.memory_space<vmem>>, vector<1x128xf32>
    %c3 = arith.constant 3 : index
    %c0_3 = arith.constant 0 : index
    %3 = vector.load %arg2[%c3, %c0_3] : memref<9x128xf32, #tpu.memory_space<vmem>>, vector<1x128xf32>
    %c4 = arith.constant 4 : index
    %c0_4 = arith.constant 0 : index
    %4 = vector.load %arg2[%c4, %c0_4] : memref<9x128xf32, #tpu.memory_space<vmem>>, vector<1x128xf32>
    %c5 = arith.constant 5 : index
    %c0_5 = arith.constant 0 : index
    %5 = vector.load %arg2[%c5, %c0_5] : memref<9x128xf32, #tpu.memory_space<vmem>>, vector<1x128xf32>
    %c6 = arith.constant 6 : index
    %c0_6 = arith.constant 0 : index
    %6 = vector.load %arg2[%c6, %c0_6] : memref<9x128xf32, #tpu.memory_space<vmem>>, vector<1x128xf32>
    %c7 = arith.constant 7 : index
    %c0_7 = arith.constant 0 : index
    %7 = vector.load %arg2[%c7, %c0_7] : memref<9x128xf32, #tpu.memory_space<vmem>>, vector<1x128xf32>
    %c8 = arith.constant 8 : index
    %c0_8 = arith.constant 0 : index
    %8 = vector.load %arg2[%c8, %c0_8] : memref<9x128xf32, #tpu.memory_space<vmem>>, vector<1x128xf32>
    %c0_9 = arith.constant 0 : index
    %c0_10 = arith.constant 0 : index
    %9 = vector.load %arg3[%c0_9, %c0_10] : memref<1x128xf32, #tpu.memory_space<vmem>>, vector<1x128xf32>
    %c0_11 = arith.constant 0 : index
    %c0_12 = arith.constant 0 : index
    %c0_13 = arith.constant 0 : index
    %10 = vector.load %arg1[%c0_11, %c0_12, %c0_13] : memref<4x257x128xf32, #tpu.memory_space<vmem>>, vector<4x1x128xf32>
    %c0_14 = arith.constant 0 : index
    %c0_15 = arith.constant 0 : index
    %c0_16 = arith.constant 0 : index
    %11 = vector.load %arg4[%c0_14, %c0_15, %c0_16] : memref<4x257x128xf32, #tpu.memory_space<vmem>>, vector<4x1x128xf32>
    tpu.vector_store %arg4[%c0_14, %c0_15, %c0_16], %10 {strides = array<i32>} : memref<4x257x128xf32, #tpu.memory_space<vmem>>, vector<4x1x128xf32>,
    %12 = tpu.iota {dimensions = array<i32: 0>} : vector<128x1xi32>
    %c16_i32 = arith.constant 16 : i32
    %c0_i32 = arith.constant 0 : i32
    %13 = arith.cmpi eq, %c16_i32, %c0_i32 : i32
    %c1_i32 = arith.constant 1 : i32
    %14 = arith.select %13, %c1_i32, %c16_i32 : i32
    %15 = vector.broadcast %14 : i32 to vector<128x1xi32>
    %16 = arith.remsi %12, %15 : vector<128x1xi32>
    %c0_i32_17 = arith.constant 0 : i32
    %17 = vector.broadcast %c0_i32_17 : i32 to vector<128x1xi32>
    %18 = arith.cmpi ne, %16, %17 : vector<128x1xi32>
    %c0_i32_18 = arith.constant 0 : i32
    %19 = vector.broadcast %c0_i32_18 : i32 to vector<128x1xi32>
    %20 = arith.cmpi slt, %16, %19 : vector<128x1xi32>
    %c0_i32_19 = arith.constant 0 : i32
    %21 = arith.cmpi slt, %14, %c0_i32_19 : i32
    %22 = vector.broadcast %21 : i1 to vector<128x1xi1>
    %23 = vector.broadcast %22 : vector<128x1xi1> to vector<128x1xi1>
    %24 = arith.xori %20, %23 : vector<128x1xi1>
    %25 = arith.andi %24, %18 : vector<128x1xi1>
    %26 = vector.broadcast %14 : i32 to vector<128x1xi32>
    %27 = arith.addi %16, %26 : vector<128x1xi32>
    %28 = arith.select %25, %27, %16 : vector<128x1xi1>, vector<128x1xi32>
    %c-1_i32 = arith.constant -1 : i32
    %29 = vector.broadcast %c-1_i32 : i32 to vector<128x1xi32>
    %30 = arith.addi %28, %29 : vector<128x1xi32>
    %c0_i32_20 = arith.constant 0 : i32
    %31 = vector.broadcast %c0_i32_20 : i32 to vector<128x1xi32>
    %32 = arith.cmpi sge, %30, %31 : vector<128x1xi32>
    %c-1_i32_21 = arith.constant -1 : i32
    %33 = vector.broadcast %c-1_i32_21 : i32 to vector<128x1xi32>
    %34 = arith.addi %28, %33 : vector<128x1xi32>
    %c16_i32_22 = arith.constant 16 : i32
    %35 = vector.broadcast %c16_i32_22 : i32 to vector<128x1xi32>
    %36 = arith.cmpi slt, %34, %35 : vector<128x1xi32>
    %37 = arith.andi %32, %36 : vector<128x1xi1>
    %c1_i32_23 = arith.constant 1 : i32
    %38 = vector.broadcast %c1_i32_23 : i32 to vector<128x1xi32>
    %39 = arith.addi %28, %38 : vector<128x1xi32>
    %c0_i32_24 = arith.constant 0 : i32
    %40 = vector.broadcast %c0_i32_24 : i32 to vector<128x1xi32>
    %41 = arith.cmpi sge, %39, %40 : vector<128x1xi32>
    %c1_i32_25 = arith.constant 1 : i32
    %42 = vector.broadcast %c1_i32_25 : i32 to vector<128x1xi32>
    %43 = arith.addi %28, %42 : vector<128x1xi32>
    %c16_i32_26 = arith.constant 16 : i32
    %44 = vector.broadcast %c16_i32_26 : i32 to vector<128x1xi32>
    %45 = arith.cmpi slt, %43, %44 : vector<128x1xi32>
    %46 = arith.andi %41, %45 : vector<128x1xi1>
    %cst = arith.constant 0.000000e+00 : f32
    %47 = vector.broadcast %cst : f32 to vector<16x128xf32>
    %c0_27 = arith.constant 0 : index
    %c0_28 = arith.constant 0 : index
    %48 = vector.load %arg5[%c0_27, %c0_28] : memref<288x128xf32, #tpu.memory_space<vmem>>, vector<16x128xf32>
    tpu.vector_store %arg5[%c0_27, %c0_28], %47 {strides = array<i32>} : memref<288x128xf32, #tpu.memory_space<vmem>>, vector<16x128xf32>,
    %cst_29 = arith.constant 0.000000e+00 : f32
    %49 = vector.broadcast %cst_29 : f32 to vector<16x128xf32>
    %c272 = arith.constant 272 : index
    %c0_30 = arith.constant 0 : index
    %50 = vector.load %arg5[%c272, %c0_30] : memref<288x128xf32, #tpu.memory_space<vmem>>, vector<16x128xf32>
    tpu.vector_store %arg5[%c272, %c0_30], %49 {strides = array<i32>} : memref<288x128xf32, #tpu.memory_space<vmem>>, vector<16x128xf32>,
    %c0_i32_31 = arith.constant 0 : i32
    %c4_i32 = arith.constant 4 : i32
    %51 = arith.addi %c0_i32_31, %c4_i32 : i32
    %c1_i32_32 = arith.constant 1 : i32
    scf.for %arg6 = %c0_i32_31 to %51 step %c1_i32_32  : i32 {
      %c0_i32_34 = arith.constant 0 : i32
      %c256_i32 = arith.constant 256 : i32
      %52 = arith.muli %c0_i32_34, %c256_i32 : i32
      %c1_i32_35 = arith.constant 1 : i32
      %53 = arith.addi %c1_i32_35, %52 : i32
      %54 = arith.index_cast %arg6 : i32 to index
      %55 = arith.index_cast %53 : i32 to index
      %c0_36 = arith.constant 0 : index
      %56 = vector.load %arg1[%54, %55, %c0_36] : memref<4x257x128xf32, #tpu.memory_space<vmem>>, vector<1x256x128xf32>
      %57 = vector.shape_cast %56 : vector<1x256x128xf32> to vector<256x128xf32>
      %c16_i32_37 = arith.constant 16 : i32
      %58 = arith.addi %c16_i32_37, %52 : i32
      %59 = tpu.assume_multiple %58, 8 : i32
      %60 = arith.index_cast %59 : i32 to index
      %c0_38 = arith.constant 0 : index
      %61 = vector.load %arg5[%60, %c0_38] : memref<288x128xf32, #tpu.memory_space<vmem>>, vector<256x128xf32>
      tpu.vector_store %arg5[%60, %c0_38], %57 {strides = array<i32>} : memref<288x128xf32, #tpu.memory_space<vmem>>, vector<256x128xf32>,
      %c1_i32_39 = arith.constant 1 : i32
      %c0_i32_40 = arith.constant 0 : i32
      %c2_i32 = arith.constant 2 : i32
      %62 = arith.addi %c0_i32_40, %c2_i32 : i32
      %c1_i32_41 = arith.constant 1 : i32
      scf.for %arg7 = %c0_i32_40 to %62 step %c1_i32_41  : i32 {
        %c128_i32 = arith.constant 128 : i32
        %63 = arith.muli %arg7, %c128_i32 : i32
        %c16_i32_43 = arith.constant 16 : i32
        %64 = arith.addi %c16_i32_43, %63 : i32
        %c-16_i32 = arith.constant -16 : i32
        %65 = arith.addi %64, %c-16_i32 : i32
        %66 = tpu.assume_multiple %65, 8 : i32
        %67 = arith.index_cast %66 : i32 to index
        %c0_44 = arith.constant 0 : index
        %68 = vector.load %arg5[%67, %c0_44] : memref<288x128xf32, #tpu.memory_space<vmem>>, vector<128x128xf32>
        %69 = vector.broadcast %0 : vector<1x128xf32> to vector<128x128xf32>
        %70 = arith.mulf %68, %69 : vector<128x128xf32>
        %71 = vector.broadcast %1 : vector<1x128xf32> to vector<128x128xf32>
        %72 = arith.mulf %68, %71 : vector<128x128xf32>
        %73 = vector.broadcast %2 : vector<1x128xf32> to vector<128x128xf32>
        %74 = arith.mulf %68, %73 : vector<128x128xf32>
        %c0_i32_45 = arith.constant 0 : i32
        %75 = arith.addi %64, %c0_i32_45 : i32
        %76 = tpu.assume_multiple %75, 8 : i32
        %77 = arith.index_cast %76 : i32 to index
        %c0_46 = arith.constant 0 : index
        %78 = vector.load %arg5[%77, %c0_46] : memref<288x128xf32, #tpu.memory_space<vmem>>, vector<128x128xf32>
        %79 = vector.broadcast %3 : vector<1x128xf32> to vector<128x128xf32>
        %80 = arith.mulf %78, %79 : vector<128x128xf32>
        %81 = arith.addf %70, %80 : vector<128x128xf32>
        %82 = vector.broadcast %4 : vector<1x128xf32> to vector<128x128xf32>
        %83 = arith.mulf %78, %82 : vector<128x128xf32>
        %84 = arith.addf %72, %83 : vector<128x128xf32>
        %85 = vector.broadcast %5 : vector<1x128xf32> to vector<128x128xf32>
        %86 = arith.mulf %78, %85 : vector<128x128xf32>
        %87 = arith.addf %74, %86 : vector<128x128xf32>
        %c16_i32_47 = arith.constant 16 : i32
        %88 = arith.addi %64, %c16_i32_47 : i32
        %89 = tpu.assume_multiple %88, 8 : i32
        %90 = arith.index_cast %89 : i32 to index
        %c0_48 = arith.constant 0 : index
        %91 = vector.load %arg5[%90, %c0_48] : memref<288x128xf32, #tpu.memory_space<vmem>>, vector<128x128xf32>
        %92 = vector.broadcast %6 : vector<1x128xf32> to vector<128x128xf32>
        %93 = arith.mulf %91, %92 : vector<128x128xf32>
        %94 = arith.addf %81, %93 : vector<128x128xf32>
        %95 = vector.broadcast %7 : vector<1x128xf32> to vector<128x128xf32>
        %96 = arith.mulf %91, %95 : vector<128x128xf32>
        %97 = arith.addf %84, %96 : vector<128x128xf32>
        %98 = vector.broadcast %8 : vector<1x128xf32> to vector<128x128xf32>
        %99 = arith.mulf %91, %98 : vector<128x128xf32>
        %100 = arith.addf %87, %99 : vector<128x128xf32>
        %101 = vector.broadcast %9 : vector<1x128xf32> to vector<128x128xf32>
        %102 = arith.addf %97, %101 : vector<128x128xf32>
        %c1_i32_49 = arith.constant 1 : i32
        %103 = tpu.dynamic_rotate %94 by %c1_i32_49 dim 0 : vector<128x128xf32>, i32 -> vector<128x128xf32>
        %cst_50 = arith.constant 0.000000e+00 : f32
        %104 = vector.shape_cast %37 : vector<128x1xi1> to vector<128x1xi1>
        %105 = vector.broadcast %104 : vector<128x1xi1> to vector<128x128xi1>
        %106 = vector.broadcast %cst_50 : f32 to vector<128x128xf32>
        %107 = arith.select %105, %103, %106 : vector<128x128xi1>, vector<128x128xf32>
        %108 = arith.addf %102, %107 : vector<128x128xf32>
        %c127_i32 = arith.constant 127 : i32
        %109 = tpu.dynamic_rotate %100 by %c127_i32 dim 0 : vector<128x128xf32>, i32 -> vector<128x128xf32>
        %cst_51 = arith.constant 0.000000e+00 : f32
        %110 = vector.shape_cast %46 : vector<128x1xi1> to vector<128x1xi1>
        %111 = vector.broadcast %110 : vector<128x1xi1> to vector<128x128xi1>
        %112 = vector.broadcast %cst_51 : f32 to vector<128x128xf32>
        %113 = arith.select %111, %109, %112 : vector<128x128xi1>, vector<128x128xf32>
        %114 = arith.addf %108, %113 : vector<128x128xf32>
        %c1_i32_52 = arith.constant 1 : i32
        %115 = arith.addi %c1_i32_52, %63 : i32
        %116 = arith.index_cast %arg6 : i32 to index
        %117 = arith.index_cast %115 : i32 to index
        %c0_53 = arith.constant 0 : index
        %118 = vector.load %arg4[%116, %117, %c0_53] : memref<4x257x128xf32, #tpu.memory_space<vmem>>, vector<1x128x128xf32>
        %119 = vector.shape_cast %118 : vector<1x128x128xf32> to vector<128x128xf32>
        %120 = vector.shape_cast %114 : vector<128x128xf32> to vector<1x128x128xf32>
        tpu.vector_store %arg4[%116, %117, %c0_53], %120 {strides = array<i32>} : memref<4x257x128xf32, #tpu.memory_space<vmem>>, vector<1x128x128xf32>,
      }
      %c2_i32_42 = arith.constant 2 : i32
    }
    %c4_i32_33 = arith.constant 4 : i32
    return
  }
  func.func @transform_0(%arg0: i32) -> (i32, i32, i32) {
    %c0_i32 = arith.constant 0 : i32
    %c0_i32_0 = arith.constant 0 : i32
    %c0_i32_1 = arith.constant 0 : i32
    return %arg0, %c0_i32, %c0_i32_0 : i32, i32, i32
  }
  func.func @transform_1(%arg0: i32) -> (i32, i32) {
    %c0_i32 = arith.constant 0 : i32
    %c0_i32_0 = arith.constant 0 : i32
    %c0_i32_1 = arith.constant 0 : i32
    return %c0_i32, %c0_i32_0 : i32, i32
  }
  func.func @transform_2(%arg0: i32) -> (i32, i32) {
    %c0_i32 = arith.constant 0 : i32
    %c0_i32_0 = arith.constant 0 : i32
    %c0_i32_1 = arith.constant 0 : i32
    return %c0_i32, %c0_i32_0 : i32, i32
  }
  func.func @transform_3(%arg0: i32) -> (i32, i32, i32) {
    %c0_i32 = arith.constant 0 : i32
    %c0_i32_0 = arith.constant 0 : i32
    %c0_i32_1 = arith.constant 0 : i32
    return %arg0, %c0_i32, %c0_i32_0 : i32, i32, i32
  }
}

</mosaic_0001>

<bundles_post_ra>
// kernel: tpu_custom_call.1
= control target key start
LH: loop header
LB: loop body
LE: loop exit
PB: predicated region body
PF: predicated region fallthrough
CT: control target
= control target key end

     0   :  { %s1409_s12 = smov 0   ;;  %s2089_s0 = inlined_call_operand.vmem [shape: f32[8,257,128], index: 0, kind: input, shape index: {}]   ;;  %s2090_s1 = inlined_call_operand.vmem [shape: f32[9,128], index: 1, kind: input, shape index: {}]   ;;  %s2091_s2 = inlined_call_operand.vmem [shape: f32[1,128], index: 2, kind: input, shape index: {}]   ;;  %s2092_s3 = inlined_call_operand.vmem [shape: f32[8,257,128], index: 3, kind: output, shape index: {}]  }
   0x1 LB: > { %s1265_s13 = sadd.s32 4294967295, %s1378_s12   ;;  %p1269_p0 = scmp.ge.s32.totalorder %s1378_s12, 1  ;;  %s1378_s12 = sphi %s1409_s12, %s13_s12  }
   0x2   : > { %p139_p1 = scmp.lt.s32.totalorder %s1378_s12, 3 }
   0x4   : > { %p140_p2 = pnand %p1269_p0, %p139_p1 }
   0x5   : > { %s1270_s14 = sshll.u32 (!%p140_p2), %s1265_s13, 2  ;;  %v1420_v0 = vld [vmem:[%s2090_s1] ss:$0 sm:$0xff] (!%p140_p2)  ;;  %v1425_v1 = vld [vmem:[%s2090_s1 + $0x1] ss:$0 sm:$0xff] (!%p140_p2)  ;;  %v197_v2 = vlaneseq (!%p140_p2)  ;;  %v1388_v5 = vmov (!%p140_p2), 0.0  }
   0x6   : > { %143 = sbr.rel (%p140_p2) target bundleno = 162 (0xa2), region = 32  ;;  %p166_p3 = scmp.lt.s32.totalorder (!%p140_p2), %s1270_s14, 7  ;;  %v1430_v3 = vld [vmem:[%s2090_s1 + $0x2] ss:$0 sm:$0xff] (!%p140_p2)  ;;  %v1435_v4 = vld [vmem:[%s2090_s1 + $0x3] ss:$0 sm:$0xff] (!%p140_p2) }
   0x7   : > { %534 = vst [vmem:[#allocation2] sm:$0xff] (!%p140_p2), %v1388_v5  ;;  %535 = vst [vmem:[#allocation2 + $0x8] sm:$0xff] (!%p140_p2), %v1388_v5  ;;  %v1440_v6 = vld [vmem:[%s2090_s1 + $0x4] ss:$0 sm:$0xff] (!%p140_p2)  ;;  %v1445_v7 = vld [vmem:[%s2090_s1 + $0x5] ss:$0 sm:$0xff] (!%p140_p2) }
   0x8   : > { %536 = vst [vmem:[#allocation2 + $0x110] sm:$0xff] (!%p140_p2), %v1388_v5  ;;  %537 = vst [vmem:[#allocation2 + $0x118] sm:$0xff] (!%p140_p2), %v1388_v5  ;;  %v1450_v8 = vld [vmem:[%s2090_s1 + $0x6] ss:$0 sm:$0xff] (!%p140_p2)  ;;  %v1455_v9 = vld [vmem:[%s2090_s1 + $0x7] ss:$0 sm:$0xff] (!%p140_p2) }
   0x9   : > { %v1460_v10 = vld [vmem:[%s2090_s1 + $0x8] ss:$0 sm:$0xff] (!%p140_p2)  ;;  %v1462_v11 = vshrl.u32 (!%p140_p2), %v197_v2, 7  ;;  %v1467_v12 = vld [vmem:[%s2091_s2] ss:$0 sm:$0xff] (!%p140_p2)  ;;  %s1551_s16 = smov (!%p140_p2), 0  }
   0xb   : > { %v199_v13 = vadd.s32 (!%p140_p2), 8, %v1462_v11  ;;  %v200_v14 = vadd.s32 (!%p140_p2), 16, %v1462_v11  ;;  %v201_v15 = vadd.s32 (!%p140_p2), 24, %v1462_v11  ;;  %v202_v16 = vadd.s32 (!%p140_p2), 32, %v1462_v11 }
   0xc   : > { %v203_v17 = vadd.s32 (!%p140_p2), 40, %v1462_v11  ;;  %v204_v18 = vadd.s32 (!%p140_p2), 48, %v1462_v11  ;;  %v205_v19 = vadd.s32 (!%p140_p2), 56, %v1462_v11  ;;  %v206_v20 = vadd.s32 (!%p140_p2), 64, %v1462_v11 }
   0xd   : > { %s2097_s14 = smov (!%p166_p3, %s1270_s14), 7  ;;  %v207_v21 = vadd.s32 72, %v1462_v11  ;;  %v208_v22 = vadd.s32 80, %v1462_v11  ;;  %v209_v23 = vadd.s32 88, %v1462_v11  ;;  %v210_v24 = vadd.s32 96, %v1462_v11 }
   0xe   : > { %s1338_s8 = smul.u32 264, %s2097_s14  ;;  %v211_v29 = vadd.s32 104, %v1462_v11  ;;  %v212_v30 = vadd.s32 112, %v1462_v11  ;;  %v213_v31 = vadd.s32 120, %v1462_v11  ;;  %v218_v32 = vand.u32 15, %v1462_v11 }
   0xf   : > { %v225_v33 = vand.u32 15, %v199_v13  ;;  %v232_v34 = vand.u32 15, %v200_v14  ;;  %v239_v35 = vand.u32 15, %v201_v15  ;;  %v246_v36 = vand.u32 15, %v202_v16 }
  0x10   : > { %s1480_s11 = scalar_lea.vmem %s2089_s0, %s1338_s8  ;;  %s1485_s15 = scalar_lea.vmem %s2092_s3, %s1338_s8  ;;  %v253_v37 = vand.u32 15, %v203_v17  ;;  %v260_v38 = vand.u32 15, %v204_v18  ;;  %v267_v39 = vand.u32 15, %v205_v19  ;;  %v274_v40 = vand.u32 15, %v206_v20 }
  0x11   : > { %v189_v25 = vld [vmem:[%s1480_s11] sm:$0x1]  ;;  %v190_v26 = vld [vmem:[%s1480_s11 + $0x108] sm:$0x1]  ;;  %v191_v27 = vld [vmem:[%s1480_s11 + $0x210] sm:$0x1] }
  0x12   : > { %193 = vst [vmem:[%s1485_s15] sm:$0x1] %v189_v25  ;;  %v192_v28 = vld [vmem:[%s1480_s11 + $0x318] sm:$0x1]  ;;  %194 = vst [vmem:[%s1485_s15 + $0x108] sm:$0x1] %v190_v26  ;;  %v281_v41 = vand.u32 15, %v207_v21 }
  0x13   : > { %195 = vst [vmem:[%s1485_s15 + $0x210] sm:$0x1] %v191_v27  ;;  %196 = vst [vmem:[%s1485_s15 + $0x318] sm:$0x1] %v192_v28  ;;  %v288_v42 = vand.u32 15, %v208_v22  ;;  %v295_v43 = vand.u32 15, %v209_v23 }
  0x14   : > { %v302_v44 = vand.u32 15, %v210_v24  ;;  %v309_v45 = vand.u32 15, %v211_v29  ;;  %v316_v46 = vand.u32 15, %v212_v30  ;;  %v323_v47 = vand.u32 15, %v213_v31 }
  0x15   : > { %v1503_v48 = vadd.s32 4294967295, %v218_v32  ;;  %v1505_v49 = vadd.s32 4294967295, %v232_v34  ;;  %v1507_v50 = vadd.s32 4294967295, %v246_v36  ;;  %v1509_v51 = vadd.s32 4294967295, %v260_v38 }
  0x16   : > { %v1511_v52 = vadd.s32 4294967295, %v274_v40  ;;  %v1513_v53 = vadd.s32 4294967295, %v288_v42  ;;  %v1515_v54 = vadd.s32 4294967295, %v302_v44  ;;  %v1517_v55 = vadd.s32 4294967295, %v316_v46 }
  0x17   : > { %vm424_vm1 = vcmp.ge.s32.totalorder %v1505_v49, 0  ;;  %vm426_vm2 = vcmp.ge.s32.totalorder %v1507_v50, 0  ;;  %vm428_vm3 = vcmp.ge.s32.totalorder %v1509_v51, 0  ;;  %v1527_v56 = vadd.s32 1, %v225_v33 }
  0x18   : > { %vm430_vm4 = vcmp.ge.s32.totalorder %v1511_v52, 0  ;;  %vm432_vm5 = vcmp.ge.s32.totalorder %v1513_v53, 0  ;;  %vm434_vm6 = vcmp.ge.s32.totalorder %v1515_v54, 0  ;;  %v1529_v57 = vadd.s32 1, %v239_v35 }
  0x19   : > { %v1531_v58 = vadd.s32 1, %v253_v37  ;;  %v1533_v59 = vadd.s32 1, %v267_v39  ;;  %v1535_v60 = vadd.s32 1, %v281_v41  ;;  %v1537_v61 = vadd.s32 1, %v295_v43 }
  0x1a   : > { %v1539_v62 = vadd.s32 1, %v309_v45  ;;  %v1541_v63 = vadd.s32 1, %v323_v47  ;;  %vm503_vm8 = vcmp.lt.s32.totalorder %v1527_v56, 16  ;;  %vm505_vm9 = vcmp.lt.s32.totalorder %v1529_v57, 16 }
  0x1b   : > { %vm507_vm10 = vcmp.lt.s32.totalorder %v1531_v58, 16  ;;  %vm509_vm11 = vcmp.lt.s32.totalorder %v1533_v59, 16  ;;  %vm511_vm12 = vcmp.lt.s32.totalorder %v1535_v60, 16  ;;  %vm513_vm13 = vcmp.lt.s32.totalorder %v1537_v61, 16 }
  0x1c   : > { %vm515_vm14 = vcmp.lt.s32.totalorder %v1539_v62, 16 }
  0x1d LB: >> { %s544_s17 = smul.u32 264, %s1382_s16  ;;  %s1594_s19 = smov 0   ;;  %s1382_s16 = sphi %s1551_s16, %s543_s16  }
  0x1f   : >> { %s1560_s18 = scalar_lea.vmem %s1480_s11, %s544_s17 }
  0x20   : >> { %v546_v2 = vld [vmem:[%s1560_s18 + $0x1] sm:$0xff]  ;;  %v547_v5 = vld [vmem:[%s1560_s18 + $0x9] sm:$0xff]  ;;  %v548_v13 = vld [vmem:[%s1560_s18 + $0x11] sm:$0xff] }
  0x21   : >> { %579 = vst [vmem:[#allocation2 + $0x10] sm:$0xff] %v546_v2  ;;  %580 = vst [vmem:[#allocation2 + $0x18] sm:$0xff] %v547_v5  ;;  %v549_v14 = vld [vmem:[%s1560_s18 + $0x19] sm:$0xff]  ;;  %v550_v15 = vld [vmem:[%s1560_s18 + $0x21] sm:$0xff] }
  0x22   : >> { %581 = vst [vmem:[#allocation2 + $0x20] sm:$0xff] %v548_v13  ;;  %v551_v16 = vld [vmem:[%s1560_s18 + $0x29] sm:$0xff]  ;;  %582 = vst [vmem:[#allocation2 + $0x28] sm:$0xff] %v549_v14  ;;  %v552_v17 = vld [vmem:[%s1560_s18 + $0x31] sm:$0xff] }
  0x23   : >> { %583 = vst [vmem:[#allocation2 + $0x30] sm:$0xff] %v550_v15  ;;  %584 = vst [vmem:[#allocation2 + $0x38] sm:$0xff] %v551_v16  ;;  %v553_v18 = vld [vmem:[%s1560_s18 + $0x39] sm:$0xff]  ;;  %v554_v19 = vld [vmem:[%s1560_s18 + $0x41] sm:$0xff] }
  0x24   : >> { %585 = vst [vmem:[#allocation2 + $0x40] sm:$0xff] %v552_v17  ;;  %586 = vst [vmem:[#allocation2 + $0x48] sm:$0xff] %v553_v18  ;;  %v555_v20 = vld [vmem:[%s1560_s18 + $0x49] sm:$0xff]  ;;  %v556_v21 = vld [vmem:[%s1560_s18 + $0x51] sm:$0xff] }
  0x25   : >> { %587 = vst [vmem:[#allocation2 + $0x50] sm:$0xff] %v554_v19  ;;  %v557_v22 = vld [vmem:[%s1560_s18 + $0x59] sm:$0xff]  ;;  %588 = vst [vmem:[#allocation2 + $0x58] sm:$0xff] %v555_v20  ;;  %v558_v23 = vld [vmem:[%s1560_s18 + $0x61] sm:$0xff] }
  0x26   : >> { %589 = vst [vmem:[#allocation2 + $0x60] sm:$0xff] %v556_v21  ;;  %590 = vst [vmem:[#allocation2 + $0x68] sm:$0xff] %v557_v22  ;;  %v559_v24 = vld [vmem:[%s1560_s18 + $0x69] sm:$0xff]  ;;  %v560_v25 = vld [vmem:[%s1560_s18 + $0x71] sm:$0xff] }
  0x27   : >> { %591 = vst [vmem:[#allocation2 + $0x70] sm:$0xff] %v558_v23  ;;  %592 = vst [vmem:[#allocation2 + $0x78] sm:$0xff] %v559_v24  ;;  %v561_v26 = vld [vmem:[%s1560_s18 + $0x79] sm:$0xff]  ;;  %v562_v27 = vld [vmem:[%s1560_s18 + $0x81] sm:$0xff] }
  0x28   : >> { %593 = vst [vmem:[#allocation2 + $0x80] sm:$0xff] %v560_v25  ;;  %v563_v28 = vld [vmem:[%s1560_s18 + $0x89] sm:$0xff]  ;;  %594 = vst [vmem:[#allocation2 + $0x88] sm:$0xff] %v561_v26  ;;  %v564_v29 = vld [vmem:[%s1560_s18 + $0x91] sm:$0xff] }
  0x29   : >> { %595 = vst [vmem:[#allocation2 + $0x90] sm:$0xff] %v562_v27  ;;  %596 = vst [vmem:[#allocation2 + $0x98] sm:$0xff] %v563_v28  ;;  %v565_v30 = vld [vmem:[%s1560_s18 + $0x99] sm:$0xff]  ;;  %v566_v31 = vld [vmem:[%s1560_s18 + $0xa1] sm:$0xff] }
  0x2a   : >> { %597 = vst [vmem:[#allocation2 + $0xa0] sm:$0xff] %v564_v29  ;;  %598 = vst [vmem:[#allocation2 + $0xa8] sm:$0xff] %v565_v30  ;;  %v567_v32 = vld [vmem:[%s1560_s18 + $0xa9] sm:$0xff]  ;;  %v568_v33 = vld [vmem:[%s1560_s18 + $0xb1] sm:$0xff] }
  0x2b   : >> { %599 = vst [vmem:[#allocation2 + $0xb0] sm:$0xff] %v566_v31  ;;  %v569_v34 = vld [vmem:[%s1560_s18 + $0xb9] sm:$0xff]  ;;  %600 = vst [vmem:[#allocation2 + $0xb8] sm:$0xff] %v567_v32  ;;  %v570_v35 = vld [vmem:[%s1560_s18 + $0xc1] sm:$0xff] }
  0x2c   : >> { %601 = vst [vmem:[#allocation2 + $0xc0] sm:$0xff] %v568_v33  ;;  %602 = vst [vmem:[#allocation2 + $0xc8] sm:$0xff] %v569_v34  ;;  %v571_v36 = vld [vmem:[%s1560_s18 + $0xc9] sm:$0xff]  ;;  %v572_v37 = vld [vmem:[%s1560_s18 + $0xd1] sm:$0xff] }
  0x2d   : >> { %603 = vst [vmem:[#allocation2 + $0xd0] sm:$0xff] %v570_v35  ;;  %604 = vst [vmem:[#allocation2 + $0xd8] sm:$0xff] %v571_v36  ;;  %v573_v38 = vld [vmem:[%s1560_s18 + $0xd9] sm:$0xff]  ;;  %v574_v39 = vld [vmem:[%s1560_s18 + $0xe1] sm:$0xff] }
  0x2e   : >> { %605 = vst [vmem:[#allocation2 + $0xe0] sm:$0xff] %v572_v37  ;;  %v575_v40 = vld [vmem:[%s1560_s18 + $0xe9] sm:$0xff]  ;;  %606 = vst [vmem:[#allocation2 + $0xe8] sm:$0xff] %v573_v38  ;;  %v576_v41 = vld [vmem:[%s1560_s18 + $0xf1] sm:$0xff] }
  0x2f   : >> { %607 = vst [vmem:[#allocation2 + $0xf0] sm:$0xff] %v574_v39  ;;  %608 = vst [vmem:[#allocation2 + $0xf8] sm:$0xff] %v575_v40  ;;  %v577_v42 = vld [vmem:[%s1560_s18 + $0xf9] sm:$0xff] }
  0x30   : >> { %609 = vst [vmem:[#allocation2 + $0x100] sm:$0xff] %v576_v41  ;;  %610 = vst [vmem:[#allocation2 + $0x108] sm:$0xff] %v577_v42 }
  0x31 LB: >>> { %s1274_s20 = sshll.u32 %s1386_s19, 7  ;;  %vm985_vm15 = vcmp.lt.s32.totalorder %v1462_v11, 1  ;;  %vm1082_vm7 = vcmp.lt.s32.totalorder %v1462_v11, 7  ;;  %vm2093_vm0 = vcmp.ge.s32.totalorder %v1503_v48, 0  ;;  %s616_s19 = sadd.s32 1, %s1386_s19   ;;  %s1386_s19 = sphi %s1594_s19, %s616_s19  }
  0x32   : >>> { %s1602_s21 = scalar_lea.vmem [#allocation2], %s1274_s20  ;;  %s1228_s22 = sadd.s32 %s1274_s20, %s544_s17 }
  0x33   : >>> { %s1691_s23 = scalar_lea.vmem %s1485_s15, %s1228_s22  ;;  %p613_p4 = scmp.ge.s32.totalorder %s616_s19, 2  }
  0x34   : >> { %s543_s16 = sadd.s32 (%p613_p4), 1, %s1382_s16  }
  0x35   : >> { %p540_p5 = scmp.ge.s32.totalorder (%p613_p4), %s543_s16, 4  }
  0x37   : >>> { %v620_v43 = vld [vmem:[%s1602_s21] sm:$0xff]  ;;  %v1606_v44 = vld [vmem:[%s1602_s21 + $0x78] sm:$0xff]  ;;  %v621_v45 = vld [vmem:[%s1602_s21 + $0x8] sm:$0xff] }
  0x38   : >>> { %v640_v46 = vmul.f32 %v1420_v0, %v620_v43  ;;  %v655_v47 = vmul.f32 %v1420_v0, %v1606_v44  ;;  %v660_v2 = vmul.f32 %v1425_v1, %v620_v43  ;;  %v680_v5 = vmul.f32 %v1430_v3, %v620_v43  ;;  %v1279_v13 = vld [vmem:[%s1602_s21 + $0x10] sm:$0xff]  ;;  %v1618_v14 = vld [vmem:[%s1602_s21 + $0x88] sm:$0xff]  ;;  %v1622_v16 = vld [vmem:[%s1602_s21 + $0x18] sm:$0xff] }
  0x39   : >>> { %v681_v15 = vmul.f32 %v1430_v3, %v621_v45  ;;  %v717_v17 = vmul.f32 %v1435_v4, %v1279_v13  ;;  %v732_v18 = vmul.f32 %v1435_v4, %v1618_v14  ;;  %v753_v19 = vmul.f32 %v1440_v6, %v1279_v13  ;;  %v1629_v20 = vld [vmem:[%s1602_s21 + $0x20] sm:$0xff]  ;;  %v1632_v21 = vld [vmem:[%s1602_s21 + $0x98] sm:$0xff]  ;;  %v1642_v29 = vld [vmem:[%s1602_s21 + $0x28] sm:$0xff] }
  0x3a   : >>> { %v789_v22 = vmul.f32 %v1445_v7, %v1279_v13  ;;  %v790_v23 = vmul.f32 %v1445_v7, %v1622_v16  ;;  %v843_v24 = vmul.f32 %v1450_v8, %v1629_v20  ;;  %v858_v25 = vmul.f32 %v1450_v8, %v1632_v21 }
  0x3b   : >>> { %v733_v26 = vadd.f32 %v717_v17, %v640_v46  ;;  %v748_v27 = vadd.f32 %v732_v18, %v655_v47  ;;  %v769_v28 = vadd.f32 %v753_v19, %v660_v2  ;;  %v879_v30 = vmul.f32 %v1455_v9, %v1629_v20 }
  0x3c   : >>> { %v805_v31 = vadd.f32 %v789_v22, %v680_v5  ;;  %v806_v32 = vadd.f32 %v790_v23, %v681_v15  ;;  %v915_v33 = vmul.f32 %v1460_v10, %v1629_v20  ;;  %v916_v34 = vmul.f32 %v1460_v10, %v1642_v29 }
  0x3d   : >>> { %v859_v35 = vadd.f32 %v843_v24, %v733_v26  ;;  %v1650_v36 = vadd.f32 %v858_v25, %v748_v27  ;;  %v895_v37 = vadd.f32 %v879_v30, %v769_v28  ;;  %v641_v38 = vmul.f32 %v1420_v0, %v621_v45  ;;  %v1685_v28 = vld [vmem:[%s1602_s21 + $0x30] sm:$0xff] }
  0x3e   : >>> { %v1653_v39 = vadd.f32 %v915_v33, %v805_v31  ;;  %v932_v40 = vadd.f32 %v916_v34, %v806_v32  ;;  %v661_v41 = vmul.f32 %v1425_v1, %v621_v45  ;;  %v682_v42 = vmul.f32 %v1279_v13, %v1430_v3 }
  0x3f   : >>> { %v953_v43 = vadd.f32 %v1467_v12, %v895_v37  ;;  %v969_v46 = vrot.slane %v859_v35, 7  ;;  %v984_v47 = vrot.slane %v1650_v36, 7  ;;  %v718_v2 = vmul.f32 %v1435_v4, %v1622_v16 }
  0x40   : >>> { %v1066_v5 = vrot.slane %v1653_v39, 1  ;;  %v1067_v15 = vrot.slane %v932_v40, 1  ;;  %v754_v17 = vmul.f32 %v1440_v6, %v1622_v16  ;;  %v791_v45 = vmul.f32 %v1629_v20, %v1445_v7 }
  0x41   : >>> { %v1001_v18 = vsel %vm985_vm15, %v984_v47, %v969_v46  ;;  %v734_v19 = vadd.f32 %v718_v2, %v641_v38  ;;  %v844_v22 = vmul.f32 %v1450_v8, %v1642_v29  ;;  %v880_v23 = vmul.f32 %v1455_v9, %v1642_v29 }
  0x42   : >>> { %v1034_v24 = vsel %vm2093_vm0, %v1001_v18, 0.0  ;;  %v1097_v25 = vsel %vm1082_vm7, %v1066_v5, %v1067_v15  ;;  %v770_v26 = vadd.f32 %v754_v17, %v661_v41  ;;  %v807_v27 = vadd.f32 %v791_v45, %v682_v42 }
  0x43   : >>> { %v1050_v30 = vadd.f32 %v1034_v24, %v953_v43  ;;  %v860_v31 = vadd.f32 %v844_v22, %v734_v19  ;;  %v917_v32 = vmul.f32 %v1460_v10, %v1685_v28  ;;  %v642_v33 = vmul.f32 %v1279_v13, %v1420_v0 }
  0x44   : >>> { %v896_v34 = vadd.f32 %v880_v23, %v770_v26  ;;  %v662_v35 = vmul.f32 %v1279_v13, %v1425_v1  ;;  %v683_v37 = vmul.f32 %v1622_v16, %v1430_v3  ;;  %v719_v38 = vmul.f32 %v1629_v20, %v1435_v4  ;;  %v1709_v23 = vld [vmem:[%s1602_s21 + $0x38] sm:$0xff] }
  0x45   : >>> { %v1147_v40 = vadd.f32 %v1097_v25, %v1050_v30  ;;  %v933_v41 = vadd.f32 %v917_v32, %v807_v27  ;;  %v970_v42 = vrot.slane %v860_v31, 7  ;;  %v755_v43 = vmul.f32 %v1629_v20, %v1440_v6 }
  0x46   : >>> { %v954_v2 = vadd.f32 %v1467_v12, %v896_v34  ;;  %v735_v17 = vadd.f32 %v719_v38, %v642_v33  ;;  %v792_v45 = vmul.f32 %v1642_v29, %v1445_v7  ;;  %v845_v13 = vmul.f32 %v1450_v8, %v1685_v28 }
  0x47   : >>> { %1320 = vst [vmem:[%s1691_s23 + $0x1] sm:$0xff] %v1147_v40  ;;  %v1000_v18 = vsel %vm985_vm15, %v969_v46, %v970_v42  ;;  %v1068_v19 = vrot.slane %v933_v41, 1  ;;  %v771_v22 = vadd.f32 %v755_v43, %v662_v35  ;;  %v881_v24 = vmul.f32 %v1455_v9, %v1685_v28 }
  0x48   : >>> { %v1051_v25 = vadd.f32 %v1000_v18, %v954_v2  ;;  %v808_v26 = vadd.f32 %v792_v45, %v683_v37  ;;  %v861_v27 = vadd.f32 %v845_v13, %v735_v17  ;;  %v918_v30 = vmul.f32 %v1460_v10, %v1709_v23 }
  0x49   : >>> { %v1096_v31 = vsel %vm1082_vm7, %v1067_v15, %v1068_v19  ;;  %v897_v32 = vadd.f32 %v881_v24, %v771_v22  ;;  %v643_v46 = vmul.f32 %v1622_v16, %v1420_v0  ;;  %v663_v33 = vmul.f32 %v1622_v16, %v1425_v1  ;;  %v1740_v24 = vld [vmem:[%s1602_s21 + $0x40] sm:$0xff] }
  0x4a   : >>> { %v1132_v34 = vsel %vm503_vm8, %v1096_v31, 0.0  ;;  %v934_v35 = vadd.f32 %v918_v30, %v808_v26  ;;  %v971_v37 = vrot.slane %v861_v27, 7  ;;  %v684_v38 = vmul.f32 %v1629_v20, %v1430_v3 }
  0x4b   : >>> { %v1148_v40 = vadd.f32 %v1132_v34, %v1051_v25  ;;  %v955_v15 = vadd.f32 %v1467_v12, %v897_v32  ;;  %v720_v41 = vmul.f32 %v1642_v29, %v1435_v4  ;;  %v756_v43 = vmul.f32 %v1642_v29, %v1440_v6 }
  0x4c   : >>> { %v999_v16 = vsel %vm985_vm15, %v970_v42, %v971_v37  ;;  %v1069_v2 = vrot.slane %v934_v35, 1  ;;  %v793_v17 = vmul.f32 %v1685_v28, %v1445_v7  ;;  %v846_v45 = vmul.f32 %v1450_v8, %v1709_v23 }
  0x4d   : >>> { %1321 = vst [vmem:[%s1691_s23 + $0x9] sm:$0xff] %v1148_v40  ;;  %v1036_v13 = vsel %vm424_vm1, %v999_v16, 0.0  ;;  %v736_v18 = vadd.f32 %v720_v41, %v643_v46  ;;  %v772_v22 = vadd.f32 %v756_v43, %v663_v33  ;;  %v882_v25 = vmul.f32 %v1455_v9, %v1709_v23 }
  0x4e   : >>> { %v1052_v26 = vadd.f32 %v1036_v13, %v955_v15  ;;  %v1095_v42 = vsel %vm1082_vm7, %v1068_v19, %v1069_v2  ;;  %v809_v27 = vadd.f32 %v793_v17, %v684_v38  ;;  %v919_v30 = vmul.f32 %v1460_v10, %v1740_v24  ;;  %v1763_v17 = vld [vmem:[%s1602_s21 + $0x48] sm:$0xff] }
  0x4f   : >>> { %v862_v31 = vadd.f32 %v846_v45, %v736_v18  ;;  %v898_v32 = vadd.f32 %v882_v25, %v772_v22  ;;  %v644_v46 = vmul.f32 %v1629_v20, %v1420_v0  ;;  %v664_v33 = vmul.f32 %v1629_v20, %v1425_v1 }
  0x50   : >>> { %v1149_v34 = vadd.f32 %v1095_v42, %v1052_v26  ;;  %v935_v35 = vadd.f32 %v919_v30, %v809_v27  ;;  %v685_v40 = vmul.f32 %v1642_v29, %v1430_v3  ;;  %v721_v19 = vmul.f32 %v1685_v28, %v1435_v4 }
  0x51   : >>> { %v956_v38 = vadd.f32 %v1467_v12, %v898_v32  ;;  %v972_v15 = vrot.slane %v862_v31, 7  ;;  %v757_v41 = vmul.f32 %v1685_v28, %v1440_v6  ;;  %v794_v43 = vmul.f32 %v1709_v23, %v1445_v7 }
  0x52   : >>> { %1322 = vst [vmem:[%s1691_s23 + $0x11] sm:$0xff] %v1149_v34  ;;  %v1070_v16 = vrot.slane %v935_v35, 1  ;;  %v737_v20 = vadd.f32 %v721_v19, %v644_v46  ;;  %v847_v45 = vmul.f32 %v1450_v8, %v1740_v24  ;;  %v883_v13 = vmul.f32 %v1455_v9, %v1740_v24 }
  0x53   : >>> { %v998_v18 = vsel %vm985_vm15, %v971_v37, %v972_v15  ;;  %v773_v22 = vadd.f32 %v757_v41, %v664_v33  ;;  %v810_v25 = vadd.f32 %v794_v43, %v685_v40  ;;  %v920_v26 = vmul.f32 %v1460_v10, %v1763_v17 }
  0x54   : >>> { %v1053_v42 = vadd.f32 %v998_v18, %v956_v38  ;;  %v1094_v27 = vsel %vm1082_vm7, %v1069_v2, %v1070_v16  ;;  %v863_v30 = vadd.f32 %v847_v45, %v737_v20  ;;  %v645_v31 = vmul.f32 %v1642_v29, %v1420_v0 }
  0x55   : >>> { %v1134_v32 = vsel %vm505_vm9, %v1094_v27, 0.0  ;;  %v899_v46 = vadd.f32 %v883_v13, %v773_v22  ;;  %v936_v34 = vadd.f32 %v920_v26, %v810_v25  ;;  %v665_v37 = vmul.f32 %v1642_v29, %v1425_v1 }
  0x56   : >>> { %v1150_v33 = vadd.f32 %v1134_v32, %v1053_v42  ;;  %v973_v35 = vrot.slane %v863_v30, 7  ;;  %v686_v40 = vmul.f32 %v1685_v28, %v1430_v3  ;;  %v722_v2 = vmul.f32 %v1709_v23, %v1435_v4  ;;  %v1802_v42 = vld [vmem:[%s1602_s21 + $0x50] sm:$0xff] }
  0x57   : >>> { %v957_v19 = vadd.f32 %v1467_v12, %v899_v46  ;;  %v1071_v38 = vrot.slane %v936_v34, 1  ;;  %v758_v41 = vmul.f32 %v1709_v23, %v1440_v6  ;;  %v795_v43 = vmul.f32 %v1740_v24, %v1445_v7 }
  0x58   : >>> { %1323 = vst [vmem:[%s1691_s23 + $0x19] sm:$0xff] %v1150_v33  ;;  %v997_v29 = vsel %vm985_vm15, %v972_v15, %v973_v35  ;;  %v738_v20 = vadd.f32 %v722_v2, %v645_v31  ;;  %v848_v45 = vmul.f32 %v1450_v8, %v1763_v17  ;;  %v884_v13 = vmul.f32 %v1455_v9, %v1763_v17 }
  0x59   : >>> { %v1038_v18 = vsel %vm426_vm2, %v997_v29, 0.0  ;;  %v1093_v22 = vsel %vm1082_vm7, %v1070_v16, %v1071_v38  ;;  %v774_v25 = vadd.f32 %v758_v41, %v665_v37  ;;  %v811_v26 = vadd.f32 %v795_v43, %v686_v40 }
  0x5a   : >>> { %v1054_v27 = vadd.f32 %v1038_v18, %v957_v19  ;;  %v864_v15 = vadd.f32 %v848_v45, %v738_v20  ;;  %v921_v30 = vmul.f32 %v1460_v10, %v1802_v42  ;;  %v646_v31 = vmul.f32 %v1685_v28, %v1420_v0 }
  0x5b   : >>> { %v900_v32 = vadd.f32 %v884_v13, %v774_v25  ;;  %v666_v46 = vmul.f32 %v1685_v28, %v1425_v1  ;;  %v687_v16 = vmul.f32 %v1709_v23, %v1430_v3  ;;  %v723_v34 = vmul.f32 %v1740_v24, %v1435_v4  ;;  %v1825_v13 = vld [vmem:[%s1602_s21 + $0x58] sm:$0xff] }
  0x5c   : >>> { %v1151_v37 = vadd.f32 %v1093_v22, %v1054_v27  ;;  %v937_v33 = vadd.f32 %v921_v30, %v811_v26  ;;  %v974_v40 = vrot.slane %v864_v15, 7  ;;  %v759_v2 = vmul.f32 %v1740_v24, %v1440_v6 }
  0x5d   : >>> { %v958_v19 = vadd.f32 %v1467_v12, %v900_v32  ;;  %v739_v41 = vadd.f32 %v723_v34, %v646_v31  ;;  %v796_v43 = vmul.f32 %v1763_v17, %v1445_v7  ;;  %v849_v28 = vmul.f32 %v1450_v8, %v1802_v42 }
  0x5e   : >>> { %1324 = vst [vmem:[%s1691_s23 + $0x21] sm:$0xff] %v1151_v37  ;;  %v996_v29 = vsel %vm985_vm15, %v973_v35, %v974_v40  ;;  %v1072_v20 = vrot.slane %v937_v33, 1  ;;  %v775_v45 = vadd.f32 %v759_v2, %v666_v46  ;;  %v885_v18 = vmul.f32 %v1455_v9, %v1802_v42 }
  0x5f   : >>> { %v1055_v22 = vadd.f32 %v996_v29, %v958_v19  ;;  %v812_v25 = vadd.f32 %v796_v43, %v687_v16  ;;  %v865_v26 = vadd.f32 %v849_v28, %v739_v41  ;;  %v922_v27 = vmul.f32 %v1460_v10, %v1825_v13 }
  0x60   : >>> { %v1092_v15 = vsel %vm1082_vm7, %v1071_v38, %v1072_v20  ;;  %v901_v30 = vadd.f32 %v885_v18, %v775_v45  ;;  %v647_v35 = vmul.f32 %v1709_v23, %v1420_v0  ;;  %v667_v31 = vmul.f32 %v1709_v23, %v1425_v1  ;;  %v1856_v18 = vld [vmem:[%s1602_s21 + $0x60] sm:$0xff] }
  0x61   : >>> { %v1136_v32 = vsel %vm507_vm10, %v1092_v15, 0.0  ;;  %v938_v46 = vadd.f32 %v922_v27, %v812_v25  ;;  %v975_v16 = vrot.slane %v865_v26, 7  ;;  %v688_v34 = vmul.f32 %v1740_v24, %v1430_v3 }
  0x62   : >>> { %v1152_v37 = vadd.f32 %v1136_v32, %v1055_v22  ;;  %v959_v38 = vadd.f32 %v1467_v12, %v901_v30  ;;  %v724_v33 = vmul.f32 %v1763_v17, %v1435_v4  ;;  %v760_v2 = vmul.f32 %v1763_v17, %v1440_v6 }
  0x63   : >>> { %v995_v23 = vsel %vm985_vm15, %v974_v40, %v975_v16  ;;  %v1073_v19 = vrot.slane %v938_v46, 1  ;;  %v797_v41 = vmul.f32 %v1802_v42, %v1445_v7  ;;  %v850_v43 = vmul.f32 %v1450_v8, %v1825_v13 }
  0x64   : >>> { %1325 = vst [vmem:[%s1691_s23 + $0x29] sm:$0xff] %v1152_v37  ;;  %v1040_v28 = vsel %vm428_vm3, %v995_v23, 0.0  ;;  %v740_v29 = vadd.f32 %v724_v33, %v647_v35  ;;  %v776_v45 = vadd.f32 %v760_v2, %v667_v31  ;;  %v886_v22 = vmul.f32 %v1455_v9, %v1825_v13 }
  0x65   : >>> { %v1056_v25 = vadd.f32 %v1040_v28, %v959_v38  ;;  %v1091_v40 = vsel %vm1082_vm7, %v1072_v20, %v1073_v19  ;;  %v813_v26 = vadd.f32 %v797_v41, %v688_v34  ;;  %v923_v27 = vmul.f32 %v1460_v10, %v1856_v18  ;;  %v1879_v41 = vld [vmem:[%s1602_s21 + $0x68] sm:$0xff] }
  0x66   : >>> { %v866_v15 = vadd.f32 %v850_v43, %v740_v29  ;;  %v902_v30 = vadd.f32 %v886_v22, %v776_v45  ;;  %v648_v35 = vmul.f32 %v1740_v24, %v1420_v0  ;;  %v668_v31 = vmul.f32 %v1740_v24, %v1425_v1 }
  0x67   : >>> { %v1153_v32 = vadd.f32 %v1091_v40, %v1056_v25  ;;  %v939_v46 = vadd.f32 %v923_v27, %v813_v26  ;;  %v689_v37 = vmul.f32 %v1763_v17, %v1430_v3  ;;  %v725_v20 = vmul.f32 %v1802_v42, %v1435_v4 }
  0x68   : >>> { %v960_v34 = vadd.f32 %v1467_v12, %v902_v30  ;;  %v976_v38 = vrot.slane %v866_v15, 7  ;;  %v761_v33 = vmul.f32 %v1802_v42, %v1440_v6  ;;  %v798_v2 = vmul.f32 %v1825_v13, %v1445_v7 }
  0x69   : >>> { %1326 = vst [vmem:[%s1691_s23 + $0x31] sm:$0xff] %v1153_v32  ;;  %v1074_v23 = vrot.slane %v939_v46, 1  ;;  %v741_v24 = vadd.f32 %v725_v20, %v648_v35  ;;  %v851_v43 = vmul.f32 %v1450_v8, %v1856_v18  ;;  %v887_v28 = vmul.f32 %v1455_v9, %v1856_v18 }
  0x6a   : >>> { %v994_v29 = vsel %vm985_vm15, %v975_v16, %v976_v38  ;;  %v777_v45 = vadd.f32 %v761_v33, %v668_v31  ;;  %v814_v22 = vadd.f32 %v798_v2, %v689_v37  ;;  %v924_v25 = vmul.f32 %v1460_v10, %v1879_v41 }
  0x6b   : >>> { %v1057_v40 = vadd.f32 %v994_v29, %v960_v34  ;;  %v1090_v26 = vsel %vm1082_vm7, %v1073_v19, %v1074_v23  ;;  %v867_v27 = vadd.f32 %v851_v43, %v741_v24  ;;  %v649_v15 = vmul.f32 %v1763_v17, %v1420_v0 }
  0x6c   : >>> { %v1138_v30 = vsel %vm509_vm11, %v1090_v26, 0.0  ;;  %v903_v35 = vadd.f32 %v887_v28, %v777_v45  ;;  %v940_v32 = vadd.f32 %v924_v25, %v814_v22  ;;  %v669_v16 = vmul.f32 %v1763_v17, %v1425_v1 }
  0x6d   : >>> { %v1154_v31 = vadd.f32 %v1138_v30, %v1057_v40  ;;  %v977_v46 = vrot.slane %v867_v27, 7  ;;  %v690_v37 = vmul.f32 %v1802_v42, %v1430_v3  ;;  %v726_v19 = vmul.f32 %v1825_v13, %v1435_v4  ;;  %v1918_v40 = vld [vmem:[%s1602_s21 + $0x70] sm:$0xff] }
  0x6e   : >>> { %v961_v20 = vadd.f32 %v1467_v12, %v903_v35  ;;  %v1075_v34 = vrot.slane %v940_v32, 1  ;;  %v762_v33 = vmul.f32 %v1825_v13, %v1440_v6  ;;  %v799_v2 = vmul.f32 %v1856_v18, %v1445_v7 }
  0x6f   : >>> { %1327 = vst [vmem:[%s1691_s23 + $0x39] sm:$0xff] %v1154_v31  ;;  %v993_v17 = vsel %vm985_vm15, %v976_v38, %v977_v46  ;;  %v742_v24 = vadd.f32 %v726_v19, %v649_v15  ;;  %v852_v43 = vmul.f32 %v1450_v8, %v1879_v41  ;;  %v888_v28 = vmul.f32 %v1455_v9, %v1879_v41 }
  0x70   : >>> { %v1042_v29 = vsel %vm430_vm4, %v993_v17, 0.0  ;;  %v1089_v45 = vsel %vm1082_vm7, %v1074_v23, %v1075_v34  ;;  %v778_v22 = vadd.f32 %v762_v33, %v669_v16  ;;  %v815_v25 = vadd.f32 %v799_v2, %v690_v37 }
  0x71   : >>> { %v1058_v26 = vadd.f32 %v1042_v29, %v961_v20  ;;  %v868_v38 = vadd.f32 %v852_v43, %v742_v24  ;;  %v925_v27 = vmul.f32 %v1460_v10, %v1918_v40  ;;  %v650_v15 = vmul.f32 %v1802_v42, %v1420_v0 }
  0x72   : >>> { %v904_v30 = vadd.f32 %v888_v28, %v778_v22  ;;  %v670_v35 = vmul.f32 %v1802_v42, %v1425_v1  ;;  %v691_v23 = vmul.f32 %v1825_v13, %v1430_v3  ;;  %v727_v32 = vmul.f32 %v1856_v18, %v1435_v4 }
  0x73   : >>> { %v1155_v16 = vadd.f32 %v1089_v45, %v1058_v26  ;;  %v941_v31 = vadd.f32 %v925_v27, %v815_v25  ;;  %v978_v37 = vrot.slane %v868_v38, 7  ;;  %v763_v19 = vmul.f32 %v1856_v18, %v1440_v6 }
  0x74   : >>> { %v962_v20 = vadd.f32 %v1467_v12, %v904_v30  ;;  %v743_v33 = vadd.f32 %v727_v32, %v650_v15  ;;  %v800_v2 = vmul.f32 %v1879_v41, %v1445_v7  ;;  %v853_v42 = vmul.f32 %v1450_v8, %v1918_v40 }
  0x75   : >>> { %1328 = vst [vmem:[%s1691_s23 + $0x41] sm:$0xff] %v1155_v16  ;;  %v992_v17 = vsel %vm985_vm15, %v977_v46, %v978_v37  ;;  %v1076_v24 = vrot.slane %v941_v31, 1  ;;  %v779_v43 = vadd.f32 %v763_v19, %v670_v35  ;;  %v889_v28 = vmul.f32 %v1455_v9, %v1918_v40 }
  0x76   : >>> { %v1059_v29 = vadd.f32 %v992_v17, %v962_v20  ;;  %v816_v45 = vadd.f32 %v800_v2, %v691_v23  ;;  %v869_v22 = vadd.f32 %v853_v42, %v743_v33  ;;  %v926_v25 = vmul.f32 %v1460_v10, %v1606_v44 }
  0x77   : >>> { %v1088_v26 = vsel %vm1082_vm7, %v1075_v34, %v1076_v24  ;;  %v905_v38 = vadd.f32 %v889_v28, %v779_v43  ;;  %v651_v27 = vmul.f32 %v1825_v13, %v1420_v0  ;;  %v671_v46 = vmul.f32 %v1825_v13, %v1425_v1  ;;  %v1969_v43 = vld [vmem:[%s1602_s21 + $0x80] sm:$0xff] }
  0x78   : >>> { %v1140_v15 = vsel %vm511_vm12, %v1088_v26, 0.0  ;;  %v942_v30 = vadd.f32 %v926_v25, %v816_v45  ;;  %v979_v35 = vrot.slane %v869_v22, 7  ;;  %v692_v23 = vmul.f32 %v1856_v18, %v1430_v3 }
  0x79   : >>> { %v1156_v32 = vadd.f32 %v1140_v15, %v1059_v29  ;;  %v963_v34 = vadd.f32 %v1467_v12, %v905_v38  ;;  %v728_v16 = vmul.f32 %v1879_v41, %v1435_v4  ;;  %v764_v31 = vmul.f32 %v1879_v41, %v1440_v6 }
  0x7a   : >>> { %v991_v13 = vsel %vm985_vm15, %v978_v37, %v979_v35  ;;  %v1077_v19 = vrot.slane %v942_v30, 1  ;;  %v801_v20 = vmul.f32 %v1918_v40, %v1445_v7  ;;  %v854_v33 = vmul.f32 %v1450_v8, %v1606_v44 }
  0x7b   : >>> { %1329 = vst [vmem:[%s1691_s23 + $0x49] sm:$0xff] %v1156_v32  ;;  %v1044_v2 = vsel %vm432_vm5, %v991_v13, 0.0  ;;  %v744_v42 = vadd.f32 %v728_v16, %v651_v27  ;;  %v780_v17 = vadd.f32 %v764_v31, %v671_v46  ;;  %v890_v28 = vmul.f32 %v1455_v9, %v1606_v44 }
  0x7c   : >>> { %v1060_v29 = vadd.f32 %v1044_v2, %v963_v34  ;;  %v1087_v37 = vsel %vm1082_vm7, %v1076_v24, %v1077_v19  ;;  %v817_v45 = vadd.f32 %v801_v20, %v692_v23  ;;  %v927_v22 = vmul.f32 %v1460_v10, %v1969_v43 }
  0x7d   : >>> { %v870_v25 = vadd.f32 %v854_v33, %v744_v42  ;;  %v906_v26 = vadd.f32 %v890_v28, %v780_v17  ;;  %v652_v38 = vmul.f32 %v1856_v18, %v1420_v0  ;;  %v672_v27 = vmul.f32 %v1856_v18, %v1425_v1 }
  0x7e   : >>> { %v1157_v46 = vadd.f32 %v1087_v37, %v1060_v29  ;;  %v943_v15 = vadd.f32 %v927_v22, %v817_v45  ;;  %v693_v30 = vmul.f32 %v1879_v41, %v1430_v3  ;;  %v729_v24 = vmul.f32 %v1918_v40, %v1435_v4 }
  0x7f   : >>> { %v964_v23 = vadd.f32 %v1467_v12, %v906_v26  ;;  %v980_v32 = vrot.slane %v870_v25, 7  ;;  %v765_v34 = vmul.f32 %v1918_v40, %v1440_v6  ;;  %v802_v16 = vmul.f32 %v1445_v7, %v1606_v44 }
  0x80   : >>> { %1330 = vst [vmem:[%s1691_s23 + $0x51] sm:$0xff] %v1157_v46  ;;  %v1078_v31 = vrot.slane %v943_v15, 1  ;;  %v745_v18 = vadd.f32 %v729_v24, %v652_v38  ;;  %v855_v13 = vmul.f32 %v1450_v8, %v1969_v43  ;;  %v891_v20 = vmul.f32 %v1455_v9, %v1969_v43 }
  0x81   : >>> { %v990_v33 = vsel %vm985_vm15, %v979_v35, %v980_v32  ;;  %v781_v2 = vadd.f32 %v765_v34, %v672_v27  ;;  %v818_v42 = vadd.f32 %v802_v16, %v693_v30  ;;  %v928_v17 = vmul.f32 %v1460_v10, %v1618_v14 }
  0x82   : >>> { %v1061_v28 = vadd.f32 %v990_v33, %v964_v23  ;;  %v1086_v29 = vsel %vm1082_vm7, %v1077_v19, %v1078_v31  ;;  %v871_v37 = vadd.f32 %v855_v13, %v745_v18  ;;  %v653_v45 = vmul.f32 %v1879_v41, %v1420_v0 }
  0x83   : >>> { %v1142_v22 = vsel %vm513_vm13, %v1086_v29, 0.0  ;;  %v907_v25 = vadd.f32 %v891_v20, %v781_v2  ;;  %v944_v26 = vadd.f32 %v928_v17, %v818_v42  ;;  %v673_v35 = vmul.f32 %v1879_v41, %v1425_v1  ;;  %v1313_v42 = vld [vmem:[%s1602_s21 + $0x90] sm:$0xff] }
  0x84   : >>> { %v1158_v38 = vadd.f32 %v1142_v22, %v1061_v28  ;;  %v981_v27 = vrot.slane %v871_v37, 7  ;;  %v694_v46 = vmul.f32 %v1918_v40, %v1430_v3  ;;  %v730_v19 = vmul.f32 %v1435_v4, %v1606_v44 }
  0x85   : >>> { %v965_v15 = vadd.f32 %v1467_v12, %v907_v25  ;;  %v1079_v30 = vrot.slane %v944_v26, 1  ;;  %v766_v24 = vmul.f32 %v1440_v6, %v1606_v44  ;;  %v803_v23 = vmul.f32 %v1969_v43, %v1445_v7 }
  0x86   : >>> { %1331 = vst [vmem:[%s1691_s23 + $0x59] sm:$0xff] %v1158_v38  ;;  %v989_v41 = vsel %vm985_vm15, %v980_v32, %v981_v27  ;;  %v746_v34 = vadd.f32 %v730_v19, %v653_v45  ;;  %v856_v16 = vmul.f32 %v1450_v8, %v1618_v14  ;;  %v892_v18 = vmul.f32 %v1455_v9, %v1618_v14 }
  0x87   : >>> { %v1046_v13 = vsel %vm434_vm6, %v989_v41, 0.0  ;;  %v1085_v20 = vsel %vm1082_vm7, %v1078_v31, %v1079_v30  ;;  %v782_v33 = vadd.f32 %v766_v24, %v673_v35  ;;  %v819_v2 = vadd.f32 %v803_v23, %v694_v46 }
  0x88   : >>> { %v1062_v17 = vadd.f32 %v1046_v13, %v965_v15  ;;  %v872_v28 = vadd.f32 %v856_v16, %v746_v34  ;;  %v929_v32 = vmul.f32 %v1460_v10, %v1313_v42  ;;  %v654_v29 = vmul.f32 %v1918_v40, %v1420_v0 }
  0x89   : >>> { %v908_v37 = vadd.f32 %v892_v18, %v782_v33  ;;  %v674_v45 = vmul.f32 %v1918_v40, %v1425_v1  ;;  %v695_v22 = vmul.f32 %v1430_v3, %v1606_v44  ;;  %v731_v31 = vmul.f32 %v1969_v43, %v1435_v4 }
  0x8a   : >>> { %v1159_v25 = vadd.f32 %v1085_v20, %v1062_v17  ;;  %v945_v26 = vadd.f32 %v929_v32, %v819_v2  ;;  %v982_v35 = vrot.slane %v872_v28, 7  ;;  %v767_v38 = vmul.f32 %v1969_v43, %v1440_v6 }
  0x8b   : >>> { %v966_v46 = vadd.f32 %v1467_v12, %v908_v37  ;;  %v747_v19 = vadd.f32 %v731_v31, %v654_v29  ;;  %v804_v15 = vmul.f32 %v1445_v7, %v1618_v14  ;;  %v857_v40 = vmul.f32 %v1450_v8, %v1313_v42 }
  0x8c   : >>> { %1332 = vst [vmem:[%s1691_s23 + $0x61] sm:$0xff] %v1159_v25  ;;  %v988_v24 = vsel %vm985_vm15, %v981_v27, %v982_v35  ;;  %v1080_v23 = vrot.slane %v945_v26, 1  ;;  %v783_v41 = vadd.f32 %v767_v38, %v674_v45  ;;  %v893_v34 = vmul.f32 %v1455_v9, %v1313_v42 }
  0x8d   : >>> { %v1063_v16 = vadd.f32 %v988_v24, %v966_v46  ;;  %v820_v18 = vadd.f32 %v804_v15, %v695_v22  ;;  %v873_v43 = vadd.f32 %v857_v40, %v747_v19  ;;  %v930_v13 = vmul.f32 %v1460_v10, %v1632_v21 }
  0x8e   : >>> { %v1084_v20 = vsel %vm1082_vm7, %v1079_v30, %v1080_v23  ;;  %v909_v33 = vadd.f32 %v893_v34, %v783_v41  ;;  %v675_v2 = vmul.f32 %v1425_v1, %v1606_v44  ;;  %v768_v27 = vmul.f32 %v1440_v6, %v1618_v14 }
  0x8f   : >>> { %v1144_v42 = vsel %vm515_vm14, %v1084_v20, 0.0  ;;  %v946_v17 = vadd.f32 %v930_v13, %v820_v18  ;;  %v983_v28 = vrot.slane %v873_v43, 7  ;;  %v894_v32 = vmul.f32 %v1455_v9, %v1632_v21 }
  0x90   : >>> { %v1160_v29 = vadd.f32 %v1144_v42, %v1063_v16  ;;  %v967_v37 = vadd.f32 %v1467_v12, %v909_v33  ;;  %v784_v30 = vadd.f32 %v768_v27, %v675_v2  ;;  %vm2094_vm0 = vcmp.ge.s32.totalorder %v1517_v55, 0 }
  0x91   : >>> { %v987_v44 = vsel %vm985_vm15, %v982_v35, %v983_v28  ;;  %v1081_v45 = vrot.slane %v946_v17, 1  ;;  %v986_v21 = vsel %vm985_vm15, %v983_v28, %v984_v47 }
  0x92   : >>> { %1333 = vst [vmem:[%s1691_s23 + $0x69] sm:$0xff] %v1160_v29  ;;  %v1048_v14 = vsel %vm2094_vm0, %v987_v44, 0.0  ;;  %v910_v22 = vadd.f32 %v894_v32, %v784_v30  ;;  %vm2095_vm0 = vcmp.lt.s32.totalorder %v1541_v63, 16 }
  0x93   : >>> { %v1064_v31 = vadd.f32 %v1048_v14, %v967_v37  ;;  %v1083_v25 = vsel %vm1082_vm7, %v1080_v23, %v1081_v45  ;;  %v1098_v26 = vsel %vm1082_vm7, %v1081_v45, %v1066_v5 }
  0x94   : >>> { %v968_v35 = vadd.f32 %v1467_v12, %v910_v22  ;;  %v1146_v46 = vsel %vm2095_vm0, %v1098_v26, 0.0  ;;  %615 = sbr.rel (!%p613_p4) target bundleno = 49 (0x31), region = 82 }
  0x95   : >>> { %v1161_v38 = vadd.f32 %v1083_v25, %v1064_v31 }
  0x96   : >>> { %v1065_v19 = vadd.f32 %v986_v21, %v968_v35 }
  0x97   : >>> { %1334 = vst [vmem:[%s1691_s23 + $0x71] sm:$0xff] %v1161_v38 }
  0x98   : >>> { %v1162_v15 = vadd.f32 %v1146_v46, %v1065_v19 }
  0x9a   : >>> { %1335 = vst [vmem:[%s1691_s23 + $0x79] sm:$0xff] %v1162_v15 }
  0x9b   : > { %542 = sbr.rel (!%p540_p5) target bundleno = 29 (0x1d), region = 93 }
  0xa2 PF: > { %s13_s12 = sadd.s32 1, %s1378_s12  }
  0xa3   : > { %p10_p6 = scmp.ge.s32.totalorder %s13_s12, 4  }
  0xa5   :  { %12 = sbr.rel (!%p10_p6) target bundleno = 1 (0x1), region = 104 }

</bundles_post_ra>
